<compile_context>
chip_gen: v5e
topology: v5e:2x2
jax: 0.10.0
libtpu: 0.0.40
codegen_flags: <defaults>
</compile_context>

<pallas_src>
import math

import jax
import jax.numpy as jnp
from jax.experimental import pallas as pl
from jax.experimental.pallas import tpu as pltpu


TM_MAX = 1024        # batch-tile rows per grid step (safe on v5e/v6e/v7x)
OUT_PAD = 128        # lane-dense padded width of the fc3 output (>= 10)


def mlp_kernel(x_ref, w1_ref, b1_ref, w2_ref, b2_ref, w3_ref, b3_ref, o_ref):
    # fc1 + relu : (TM, 784)bf16 @ (784, 128)bf16 -> f32 accumulator
    h1 = jnp.dot(x_ref[...], w1_ref[...], preferred_element_type=jnp.float32)
    h1 = jnp.maximum(h1 + b1_ref[...], 0.0)
    # fc2 + relu : keep the MXU in bf16 mode, accumulate in f32
    h2 = jnp.dot(h1.astype(jnp.bfloat16), w2_ref[...],
                 preferred_element_type=jnp.float32)
    h2 = jnp.maximum(h2 + b2_ref[...], 0.0)
    # fc3 (no activation), lane-dense padded to OUT_PAD columns
    out = jnp.dot(h2.astype(jnp.bfloat16), w3_ref[...],
                  preferred_element_type=jnp.float32)
    o_ref[...] = (out + b3_ref[...]).astype(o_ref.dtype)


def _round_up(n, m):
    return ((n + m - 1) // m) * m


def net_forward(x_nchw, params):
    """Forward pass of Net.  x_nchw: (B, 1, 28, 28) float32 -> (B, 10) float32."""
    w1, b1, w2, b2, w3, b3 = params
    b = x_nchw.shape[0]
    x = x_nchw.reshape(b, 784)                       # x.view(-1, 784)

    # --- lane-dense padding of the final layer (zero cols -> sliced off) ---
    w3p = jnp.zeros((64, OUT_PAD), jnp.float32).at[:, :10].set(w3)
    b3p = jnp.zeros((1, OUT_PAD), jnp.float32).at[:, :10].set(b3)

    # --- batch tiling: TM rows per grid step, batch padded to a multiple ---
    tm = min(TM_MAX, _round_up(b, 16))               # multiple of 16 for bf16 sublanes
    n_blocks = pl.cdiv(b, tm)
    bp = n_blocks * tm

    x_b = x.astype(jnp.bfloat16)
    if bp != b:
        x_b = jnp.pad(x_b, ((0, bp - b), (0, 0)))    # zero rows, sliced off below

    w1b = w1.astype(jnp.bfloat16)
    w2b = w2.astype(jnp.bfloat16)
    w3b = w3p.astype(jnp.bfloat16)

    flops = 2 * bp * (784 * 128 + 128 * 64 + 64 * OUT_PAD)
    bytes_accessed = (bp * 784 * 2                                    # x (bf16)
                      + (784 * 128 + 128 * 64 + 64 * OUT_PAD) * 2     # weights (bf16)
                      + (128 + 64 + OUT_PAD) * 4                      # biases (f32)
                      + bp * OUT_PAD * 4)                             # out (f32)

    out = pl.pallas_call(
        mlp_kernel,
        out_shape=jax.ShapeDtypeStruct((bp, OUT_PAD), jnp.float32),
        grid=(n_blocks,),
        in_specs=[
            pl.BlockSpec((tm, 784), lambda i: (i, 0)),        # x tile (streamed)
            pl.BlockSpec((784, 128), lambda i: (0, 0)),       # w1 (resident)
            pl.BlockSpec((1, 128), lambda i: (0, 0)),         # b1
            pl.BlockSpec((128, 64), lambda i: (0, 0)),        # w2
            pl.BlockSpec((1, 64), lambda i: (0, 0)),          # b2
            pl.BlockSpec((64, OUT_PAD), lambda i: (0, 0)),    # w3 (padded)
            pl.BlockSpec((1, OUT_PAD), lambda i: (0, 0)),     # b3 (padded)
        ],
        out_specs=pl.BlockSpec((tm, OUT_PAD), lambda i: (i, 0)),
        compiler_params=pltpu.CompilerParams(
            dimension_semantics=("parallel",),                # megacore on v7x
        ),
        cost_estimate=pl.CostEstimate(
            flops=flops, transcendentals=0, bytes_accessed=bytes_accessed),
    )(x_b, w1b, b1, w2b, b2, w3b, b3p)

    return out[:b, :10]


def init_params(key):
    """Deterministic init mirroring nn.Linear's default (uniform +/- 1/sqrt(fan_in)).

    Weights are stored as (in_features, out_features) so the kernel does x @ W
    directly (PyTorch stores (out, in) and does x @ W.T).
    """
    def linear(key, fan_in, fan_out):
        kw, kb = jax.random.split(key)
        bound = 1.0 / math.sqrt(fan_in)
        w = jax.random.uniform(kw, (fan_in, fan_out), jnp.float32, -bound, bound)
        b = jax.random.uniform(kb, (1, fan_out), jnp.float32, -bound, bound)
        return w, b

    k1, k2, k3 = jax.random.split(key, 3)
    w1, b1 = linear(k1, 784, 128)
    w2, b2 = linear(k2, 128, 64)
    w3, b3 = linear(k3, 64, 10)
    return (w1, b1, w2, b2, w3, b3)


if __name__ == "__main__":
    key = jax.random.PRNGKey(0)
    k_params, k_x = jax.random.split(key)

    params = init_params(k_params)
    # Small MNIST-like batch: (B, C, H, W) = (8, 1, 28, 28)
    x = jax.random.normal(k_x, (8, 1, 28, 28), jnp.float32)

    out = net_forward(x, params)
    out = jax.block_until_ready(out)

    # Cross-check against a plain-JAX f32 reference (bf16 matmul inputs with
    # f32 accumulation => loosened tolerance vs the pure-f32 reference).
    w1, b1, w2, b2, w3, b3 = params
    xr = x.reshape(-1, 784)
    h1 = jnp.maximum(xr @ w1 + b1, 0.0)
    h2 = jnp.maximum(h1 @ w2 + b2, 0.0)
    ref = h2 @ w3 + b3

    assert out.shape == (8, 10)
    assert jnp.allclose(out, ref, atol=2e-2, rtol=2e-2), (
        float(jnp.max(jnp.abs(out - ref))))

    print("KERNEL_OK")
</pallas_src>

<mosaic_0001>
module attributes {stable_mosaic.version = 11 : i64} {
  func.func @mlp_kernel(%arg0: i32, %arg1: memref<16x784xbf16, #tpu.memory_space<vmem>>, %arg2: memref<784x128xbf16, #tpu.memory_space<vmem>>, %arg3: memref<1x128xf32, #tpu.memory_space<vmem>>, %arg4: memref<128x64xbf16, #tpu.memory_space<vmem>>, %arg5: memref<1x64xf32, #tpu.memory_space<vmem>>, %arg6: memref<64x128xbf16, #tpu.memory_space<vmem>>, %arg7: memref<1x128xf32, #tpu.memory_space<vmem>>, %arg8: memref<16x128xf32, #tpu.memory_space<vmem>>) attributes {dimension_semantics = [#tpu.dimension_semantics<parallel>], iteration_bounds = array<i64: 1>, scalar_prefetch = 0 : i64, scratch_operands = 0 : i64, tpu.core_type = #tpu.core_type<tc>, window_params = [{transform_indices = @transform_0, window_bounds = array<i64: 16, 784>}, {pipeline_mode = #tpu.pipeline_mode<synchronous>, transform_indices = @transform_1, window_bounds = array<i64: 784, 128>}, {pipeline_mode = #tpu.pipeline_mode<synchronous>, transform_indices = @transform_2, window_bounds = array<i64: 1, 128>}, {pipeline_mode = #tpu.pipeline_mode<synchronous>, transform_indices = @transform_3, window_bounds = array<i64: 128, 64>}, {pipeline_mode = #tpu.pipeline_mode<synchronous>, transform_indices = @transform_4, window_bounds = array<i64: 1, 64>}, {pipeline_mode = #tpu.pipeline_mode<synchronous>, transform_indices = @transform_5, window_bounds = array<i64: 64, 128>}, {pipeline_mode = #tpu.pipeline_mode<synchronous>, transform_indices = @transform_6, window_bounds = array<i64: 1, 128>}, {transform_indices = @transform_7, window_bounds = array<i64: 16, 128>}]} {
    %c0 = arith.constant 0 : index
    %c0_0 = arith.constant 0 : index
    %0 = vector.load %arg1[%c0, %c0_0] : memref<16x784xbf16, #tpu.memory_space<vmem>>, vector<16x784xbf16>
    %c0_1 = arith.constant 0 : index
    %c0_2 = arith.constant 0 : index
    %1 = vector.load %arg2[%c0_1, %c0_2] : memref<784x128xbf16, #tpu.memory_space<vmem>>, vector<784x128xbf16>
    %cst = arith.constant dense<0.000000e+00> : vector<16x128xf32>
    %2 = tpu.matmul %0, %1, %cst {dimension_numbers = #tpu.dot_dimension_numbers<[1], [0], [0], [1], [0, 0, 1, 1], [], []>} : vector<16x784xbf16>, vector<784x128xbf16>, vector<16x128xf32> -> vector<16x128xf32>
    %c0_3 = arith.constant 0 : index
    %c0_4 = arith.constant 0 : index
    %3 = vector.load %arg3[%c0_3, %c0_4] : memref<1x128xf32, #tpu.memory_space<vmem>>, vector<1x128xf32>
    %4 = vector.broadcast %3 : vector<1x128xf32> to vector<16x128xf32>
    %5 = arith.addf %2, %4 : vector<16x128xf32>
    %cst_5 = arith.constant 0.000000e+00 : f32
    %6 = vector.broadcast %cst_5 : f32 to vector<16x128xf32>
    %7 = arith.maximumf %5, %6 : vector<16x128xf32>
    %8 = arith.truncf %7 : vector<16x128xf32> to vector<16x128xbf16>
    %c0_6 = arith.constant 0 : index
    %c0_7 = arith.constant 0 : index
    %9 = vector.load %arg4[%c0_6, %c0_7] : memref<128x64xbf16, #tpu.memory_space<vmem>>, vector<128x64xbf16>
    %cst_8 = arith.constant dense<0.000000e+00> : vector<16x64xf32>
    %10 = tpu.matmul %8, %9, %cst_8 {dimension_numbers = #tpu.dot_dimension_numbers<[1], [0], [0], [1], [0, 0, 1, 1], [], []>} : vector<16x128xbf16>, vector<128x64xbf16>, vector<16x64xf32> -> vector<16x64xf32>
    %c0_9 = arith.constant 0 : index
    %c0_10 = arith.constant 0 : index
    %11 = vector.load %arg5[%c0_9, %c0_10] : memref<1x64xf32, #tpu.memory_space<vmem>>, vector<1x64xf32>
    %12 = vector.broadcast %11 : vector<1x64xf32> to vector<16x64xf32>
    %13 = arith.addf %10, %12 : vector<16x64xf32>
    %cst_11 = arith.constant 0.000000e+00 : f32
    %14 = vector.broadcast %cst_11 : f32 to vector<16x64xf32>
    %15 = arith.maximumf %13, %14 : vector<16x64xf32>
    %16 = arith.truncf %15 : vector<16x64xf32> to vector<16x64xbf16>
    %c0_12 = arith.constant 0 : index
    %c0_13 = arith.constant 0 : index
    %17 = vector.load %arg6[%c0_12, %c0_13] : memref<64x128xbf16, #tpu.memory_space<vmem>>, vector<64x128xbf16>
    %cst_14 = arith.constant dense<0.000000e+00> : vector<16x128xf32>
    %18 = tpu.matmul %16, %17, %cst_14 {dimension_numbers = #tpu.dot_dimension_numbers<[1], [0], [0], [1], [0, 0, 1, 1], [], []>} : vector<16x64xbf16>, vector<64x128xbf16>, vector<16x128xf32> -> vector<16x128xf32>
    %c0_15 = arith.constant 0 : index
    %c0_16 = arith.constant 0 : index
    %19 = vector.load %arg7[%c0_15, %c0_16] : memref<1x128xf32, #tpu.memory_space<vmem>>, vector<1x128xf32>
    %20 = vector.broadcast %19 : vector<1x128xf32> to vector<16x128xf32>
    %21 = arith.addf %18, %20 : vector<16x128xf32>
    %c0_17 = arith.constant 0 : index
    %c0_18 = arith.constant 0 : index
    %22 = vector.load %arg8[%c0_17, %c0_18] : memref<16x128xf32, #tpu.memory_space<vmem>>, vector<16x128xf32>
    tpu.vector_store %arg8[%c0_17, %c0_18], %21 {strides = array<i32>} : memref<16x128xf32, #tpu.memory_space<vmem>>, vector<16x128xf32>,
    return
  }
  func.func @transform_0(%arg0: i32) -> (i32, i32) {
    %c0_i32 = arith.constant 0 : i32
    %c0_i32_0 = arith.constant 0 : i32
    return %arg0, %c0_i32 : i32, i32
  }
  func.func @transform_1(%arg0: i32) -> (i32, i32) {
    %c0_i32 = arith.constant 0 : i32
    %c0_i32_0 = arith.constant 0 : i32
    %c0_i32_1 = arith.constant 0 : i32
    return %c0_i32, %c0_i32_0 : i32, i32
  }
  func.func @transform_2(%arg0: i32) -> (i32, i32) {
    %c0_i32 = arith.constant 0 : i32
    %c0_i32_0 = arith.constant 0 : i32
    %c0_i32_1 = arith.constant 0 : i32
    return %c0_i32, %c0_i32_0 : i32, i32
  }
  func.func @transform_3(%arg0: i32) -> (i32, i32) {
    %c0_i32 = arith.constant 0 : i32
    %c0_i32_0 = arith.constant 0 : i32
    %c0_i32_1 = arith.constant 0 : i32
    return %c0_i32, %c0_i32_0 : i32, i32
  }
  func.func @transform_4(%arg0: i32) -> (i32, i32) {
    %c0_i32 = arith.constant 0 : i32
    %c0_i32_0 = arith.constant 0 : i32
    %c0_i32_1 = arith.constant 0 : i32
    return %c0_i32, %c0_i32_0 : i32, i32
  }
  func.func @transform_5(%arg0: i32) -> (i32, i32) {
    %c0_i32 = arith.constant 0 : i32
    %c0_i32_0 = arith.constant 0 : i32
    %c0_i32_1 = arith.constant 0 : i32
    return %c0_i32, %c0_i32_0 : i32, i32
  }
  func.func @transform_6(%arg0: i32) -> (i32, i32) {
    %c0_i32 = arith.constant 0 : i32
    %c0_i32_0 = arith.constant 0 : i32
    %c0_i32_1 = arith.constant 0 : i32
    return %c0_i32, %c0_i32_0 : i32, i32
  }
  func.func @transform_7(%arg0: i32) -> (i32, i32) {
    %c0_i32 = arith.constant 0 : i32
    %c0_i32_0 = arith.constant 0 : i32
    return %arg0, %c0_i32 : i32, i32
  }
}

</mosaic_0001>

<bundles_post_ra>
// kernel: tpu_custom_call.1
= control target key start
LH: loop header
LB: loop body
LE: loop exit
PB: predicated region body
PF: predicated region fallthrough
CT: control target
= control target key end

     0   :  { %12 = vsyncpa [#allocation3], 0  ;;  %s1290_s0 = inlined_call_operand.vmem [shape: bf16[16,784], index: 0, kind: input, shape index: {}]   ;;  %s1291_s1 = inlined_call_operand.hbm [shape: bf16[784,128], index: 1, kind: input, shape index: {}]   ;;  %s1292_s2 = inlined_call_operand.vmem [shape: f32[1,128], index: 2, kind: input, shape index: {}]   ;;  %s1293_s3 = inlined_call_operand.vmem [shape: bf16[128,64], index: 3, kind: input, shape index: {}]   ;;  %s1294_s4 = inlined_call_operand.vmem [shape: f32[1,64], index: 4, kind: input, shape index: {}]   ;;  %s1295_s5 = inlined_call_operand.vmem [shape: bf16[64,128], index: 5, kind: input, shape index: {}]   ;;  %s1296_s6 = inlined_call_operand.vmem [shape: f32[1,128], index: 6, kind: input, shape index: {}]   ;;  %s1297_s7 = inlined_call_operand.hbm [shape: f32[16,128], index: 7, kind: output, shape index: {}]  }
   0x1   :  { %13 = vsyncpa [#allocation4], 0  ;;  %s20_s26 = sshll.u32 %s1291_s1, 4  ;;  %s1151_s27 = smov [#allocation2]   ;;  %s21_s26 = int_to_ptr.hbm [resolvable:$true] %s20_s26 }
   0x2   :  { %s22_s28 = sshll.u32 %s1151_s27, 4  ;;  %s1152_s29 = smov 64   ;;  %s23_s28 = int_to_ptr.vmem [resolvable:$true] %s22_s28 }
   0x3   :  { %s1153_s30 = smov 4  }
   0x4   :  { %28 = dma.hbm_to_vmem [thread:$0]  %s21_s26, 6272, %s23_s28, [#allocation3], %s1152_s29, %s1152_s29, %s1153_s30  }
   0x5   :  { %1147 = dma.done.wait [#allocation3], 6272  }
   0x6   :  { %1148 = vsyncadd [#allocation3], 4294961024  ;;  %v1036_v0 = vld [vmem:[#allocation2 + $0x38] sm:$0xff]  ;;  %v1035_v4 = vld [vmem:[#allocation2 + $0x30] sm:$0xff]  ;;  %vm483_vm0 = vcmask 130048   ;;  %vm709_vm1 = vcmask 523264  }
   0x7   :  { %v1044_v1 = vld [vmem:[#allocation2 + $0x78] sm:$0xff]  ;;  %487 = vmatpush.bf16.msra.mxu0 %v1036_v0  ;;  %v1043_v5 = vld [vmem:[#allocation2 + $0x70] sm:$0xff]  ;;  %v1034_v8 = vld [vmem:[#allocation2 + $0x28] sm:$0xff]  ;;  %s1156_s17 = smov 8  }
   0x8   :  { %v1052_v2 = vld [vmem:[#allocation2 + $0xb8] sm:$0xff]  ;;  %501 = vmatpush.bf16.msra.mxu1 %v1044_v1  ;;  %v1051_v6 = vld [vmem:[#allocation2 + $0xb0] sm:$0xff]  ;;  %v1042_v9 = vld [vmem:[#allocation2 + $0x68] sm:$0xff] }
   0x9   :  { %v1060_v3 = vld [vmem:[#allocation2 + $0xf8] sm:$0xff]  ;;  %515 = vmatpush.bf16.msra.mxu2 %v1052_v2  ;;  %v1059_v7 = vld [vmem:[#allocation2 + $0xf0] sm:$0xff]  ;;  %v1050_v10 = vld [vmem:[#allocation2 + $0xa8] sm:$0xff] }
   0xa   :  { %529 = vmatpush.bf16.msra.mxu3 %v1060_v3  ;;  %v1058_v11 = vld [vmem:[#allocation2 + $0xe8] sm:$0xff]  ;;  %v1033_v12 = vld [vmem:[#allocation2 + $0x20] sm:$0xff]  ;;  %v1032_v16 = vld [vmem:[#allocation2 + $0x18] sm:$0xff] }
   0xb   :  { %488 = vmatpush.bf16.msra.mxu0 %v1035_v4  ;;  %v1041_v13 = vld [vmem:[#allocation2 + $0x60] sm:$0xff]  ;;  %v1040_v17 = vld [vmem:[#allocation2 + $0x58] sm:$0xff]  ;;  %v1031_v20 = vld [vmem:[#allocation2 + $0x10] sm:$0xff] }
   0xc   :  { %502 = vmatpush.bf16.msra.mxu1 %v1043_v5  ;;  %v1049_v14 = vld [vmem:[#allocation2 + $0xa0] sm:$0xff]  ;;  %v1048_v18 = vld [vmem:[#allocation2 + $0x98] sm:$0xff]  ;;  %v1039_v21 = vld [vmem:[#allocation2 + $0x50] sm:$0xff] }
   0xd   :  { %516 = vmatpush.bf16.msra.mxu2 %v1051_v6  ;;  %v1057_v15 = vld [vmem:[#allocation2 + $0xe0] sm:$0xff]  ;;  %v1056_v19 = vld [vmem:[#allocation2 + $0xd8] sm:$0xff]  ;;  %v1047_v22 = vld [vmem:[#allocation2 + $0x90] sm:$0xff] }
   0xe   :  { %530 = vmatpush.bf16.msra.mxu3 %v1059_v7  ;;  %v1055_v23 = vld [vmem:[#allocation2 + $0xd0] sm:$0xff]  ;;  %v1030_v24 = vld [vmem:[#allocation2 + $0x8] sm:$0xff]  ;;  %v1029_v28 = vld [vmem:[#allocation2] sm:$0xff] }
   0xf   :  { %489 = vmatpush.bf16.msra.mxu0 %v1034_v8  ;;  %v1038_v25 = vld [vmem:[#allocation2 + $0x48] sm:$0xff]  ;;  %v1037_v29 = vld [vmem:[#allocation2 + $0x40] sm:$0xff]  ;;  %v1025_v31 = vld [vmem:[%s1290_s0 + $0x18] sm:$0xf0] }
  0x10   :  { %503 = vmatpush.bf16.msra.mxu1 %v1042_v9  ;;  %v1046_v26 = vld [vmem:[#allocation2 + $0x88] sm:$0xff]  ;;  %v750_v30 = vld [vmem:[%s1290_s0] sm:$0xf]  ;;  %v1022_v32 = vld [vmem:[%s1290_s0 + $0x4] sm:$0xf] }
  0x11   :  { %517 = vmatpush.bf16.msra.mxu2 %v1050_v10  ;;  %v1054_v27 = vld [vmem:[#allocation2 + $0xc8] sm:$0xff]  ;;  %v752_v33 = vld [vmem:[%s1290_s0 + $0x1c] sm:$0xf0]  ;;  %v1068_v34 = vld [vmem:[#allocation2 + $0x138] sm:$0xff]  ;;  %v751_v40 = vor.u32 %v1025_v31, %v750_v30 }
  0x12   :  { %531 = vmatpush.bf16.msra.mxu3 %v1058_v11  ;;  %v1076_v35 = vld [vmem:[#allocation2 + $0x178] sm:$0xff]  ;;  %v1045_v36 = vld [vmem:[#allocation2 + $0x80] sm:$0xff]  ;;  %v758_v38 = vld [vmem:[%s1290_s0 + $0x8] sm:$0xf]  ;;  %v755_v43 = vor.u32 %v1022_v32, %v752_v33 }
  0x13   :  { %490 = vmatpush.bf16.msra.mxu0 %v1033_v12  ;;  %v1053_v37 = vld [vmem:[#allocation2 + $0xc0] sm:$0xff]  ;;  %v1023_v41 = vld [vmem:[%s1290_s0 + $0xc] sm:$0xf]  ;;  %v760_v42 = vld [vmem:[%s1290_s0 + $0x24] sm:$0xf0] }
  0x14   :  { %504 = vmatpush.bf16.msra.mxu1 %v1041_v13  ;;  %v1026_v39 = vld [vmem:[%s1290_s0 + $0x20] sm:$0xf0]  ;;  %v1067_v45 = vld [vmem:[#allocation2 + $0x130] sm:$0xff]  ;;  %v763_v48 = vor.u32 %v1023_v41, %v760_v42  ;;  %v1066_v49 = vld [vmem:[#allocation2 + $0x128] sm:$0xff] }
  0x15   :  { %518 = vmatpush.bf16.msra.mxu2 %v1049_v14  ;;  %v1077_v44 = vld [vmem:[#allocation2 + $0x180] sm:$0xff]  ;;  %v1075_v46 = vld [vmem:[#allocation2 + $0x170] sm:$0xff]  ;;  %v759_v47 = vor.u32 %v1026_v39, %v758_v38  ;;  %v1074_v50 = vld [vmem:[#allocation2 + $0x168] sm:$0xff] }
  0x16   :  { %532 = vmatpush.bf16.msra.mxu3 %v1057_v15  ;;  %v1065_v51 = vld [vmem:[#allocation2 + $0x120] sm:$0xff]  ;;  %v1064_v53 = vld [vmem:[#allocation2 + $0x118] sm:$0xff]  ;;  %v1028_v56 = vld [vmem:[%s1290_s0 + $0x30] sm:$0xf0] }
  0x17   :  { %491 = vmatpush.bf16.msra.mxu0 %v1032_v16  ;;  %v1073_v52 = vld [vmem:[#allocation2 + $0x160] sm:$0xff]  ;;  %v1072_v54 = vld [vmem:[#allocation2 + $0x158] sm:$0xff]  ;;  %v1063_v57 = vld [vmem:[#allocation2 + $0x110] sm:$0xff] }
  0x18   :  { %505 = vmatpush.bf16.msra.mxu1 %v1040_v17  ;;  %v774_v55 = vld [vmem:[%s1290_s0 + $0x18] sm:$0xf]  ;;  %v1071_v58 = vld [vmem:[#allocation2 + $0x150] sm:$0xff]  ;;  %v1062_v60 = vld [vmem:[#allocation2 + $0x108] sm:$0xff] }
  0x19   :  { %519 = vmatpush.bf16.msra.mxu2 %v1048_v18  ;;  %v775_v59 = vor.u32 %v1028_v56, %v774_v55  ;;  %v1070_v61 = vld [vmem:[#allocation2 + $0x148] sm:$0xff]  ;;  %v1061_v62 = vld [vmem:[#allocation2 + $0x100] sm:$0xff]  ;;  %v766_v0 = vld [vmem:[%s1290_s0 + $0x10] sm:$0xf] }
  0x1a   :  { %533 = vmatpush.bf16.msra.mxu3 %v1056_v19  ;;  %v1069_v63 = vld [vmem:[#allocation2 + $0x140] sm:$0xff]  ;;  %v1027_v1 = vld [vmem:[%s1290_s0 + $0x28] sm:$0xf0]  ;;  %v1024_v2 = vld [vmem:[%s1290_s0 + $0x14] sm:$0xf] }
  0x1b   :  { %492 = vmatpush.bf16.msra.mxu0 %v1031_v20  ;;  %v768_v3 = vld [vmem:[%s1290_s0 + $0x2c] sm:$0xf0]  ;;  %v767_v4 = vor.u32 %v1027_v1, %v766_v0  ;;  %v1085_v6 = vld [vmem:[%s1293_s3 + $0x38] sm:$0xff]  ;;  %v1083_v8 = vld [vmem:[%s1293_s3 + $0x28] sm:$0xff]  ;;  %s1155_s0 = smov 128  }
  0x1c   :  { %506 = vmatpush.bf16.msra.mxu1 %v1039_v21  ;;  %v771_v5 = vor.u32 %v1024_v2, %v768_v3  ;;  %v1084_v7 = vld [vmem:[%s1293_s3 + $0x30] sm:$0xff]  ;;  %v1082_v9 = vld [vmem:[%s1293_s3 + $0x20] sm:$0xff]  ;;  %v1081_v10 = vld [vmem:[%s1293_s3 + $0x18] sm:$0xff] }
  0x1d   :  { %520 = vmatpush.bf16.msra.mxu2 %v1047_v22  ;;  %v1080_v11 = vld [vmem:[%s1293_s3 + $0x10] sm:$0xff]  ;;  %v1079_v12 = vld [vmem:[%s1293_s3 + $0x8] sm:$0xff]  ;;  %v1078_v16 = vld [vmem:[%s1293_s3] sm:$0xff] }
  0x1e   :  { %534 = vmatpush.bf16.msra.mxu3 %v1055_v23  ;;  %v1096_v17 = vld [vmem:[%s1292_s2] ss:$0 sm:$0xff]  ;;  %v1089_v18 = vld [vmem:[%s1295_s5 + $0x18] sm:$0xff] }
  0x1f   :  { %493 = vmatpush.bf16.msra.mxu0 %v1030_v24 }
  0x20   :  { %507 = vmatpush.bf16.msra.mxu1 %v1038_v25 }
  0x21   :  { %521 = vmatpush.bf16.msra.mxu2 %v1046_v26 }
  0x22   :  { %535 = vmatpush.bf16.msra.mxu3 %v1054_v27 }
  0x23   :  { %494 = vmatpush.bf16.msra.mxu0 %v1029_v28 }
  0x24   :  { %508 = vmatpush.bf16.msra.mxu1 %v1037_v29 }
  0x25   :  { %522 = vmatpush.bf16.msra.mxu2 %v1045_v36 }
  0x26   :  { %536 = vmatpush.bf16.msra.mxu3 %v1053_v37  ;;  %495 = vmatmul.bf16.vlgmr.msra.gmra.mxu0 %v751_v40 }
  0x27   :  { %543 = vmatpush.bf16.msrb.mxu0 %v1068_v34  ;;  %509 = vmatmul.bf16.vlgmr.msra.gmra.mxu1 %v755_v43 }
  0x28   :  { %557 = vmatpush.bf16.msrb.mxu1 %v1076_v35  ;;  %523 = vmatmul.bf16.vlgmr.msra.gmra.mxu2 %v759_v47  ;;  %v1088_v47 = vld [vmem:[%s1295_s5 + $0x10] sm:$0xff] }
  0x29   :  { %578 = vmatpush.bf16.msrb.mxu2 %v1077_v44  ;;  %537 = vmatmul.bf16.vlgmr.msra.gmra.mxu3 %v763_v48  ;;  %v1087_v48 = vld [vmem:[%s1295_s5 + $0x8] sm:$0xff] }
  0x2a   :  { %656 = vmatpush.bf16.msrb.mxu3 %v1085_v6 }
  0x2b   :  { %544 = vmatpush.bf16.msrb.mxu0 %v1067_v45 }
  0x2c   :  { %558 = vmatpush.bf16.msrb.mxu1 %v1075_v46 }
  0x2d   :  { %717 = vmatpush.bf16.msra.mxu2 %v1089_v18 }
  0x2e   :  { %657 = vmatpush.bf16.msrb.mxu3 %v1084_v7 }
  0x2f   :  { %545 = vmatpush.bf16.msrb.mxu0 %v1066_v49  ;;  %v1086_v49 = vld [vmem:[%s1295_s5] sm:$0xff]  ;;  %s1154_s5 = smov [#allocation5]  }
  0x30   :  { %559 = vmatpush.bf16.msrb.mxu1 %v1074_v50  ;;  %s733_s14 = sshll.u32 %s1154_s5, 4  ;;  %s734_s14 = int_to_ptr.vmem [resolvable:$true] %s733_s14 }
  0x31   :  { %718 = vmatpush.bf16.msra.mxu2 %v1088_v47 }
  0x32   :  { %658 = vmatpush.bf16.msrb.mxu3 %v1083_v8 }
  0x33   :  { %546 = vmatpush.bf16.msrb.mxu0 %v1065_v51  ;;  %v1097_v51 = vld [vmem:[%s1294_s4] ss:$0 sm:$0xff]  ;;  %s735_s4 = sshll.u32 %s1297_s7, 4  ;;  %s736_s4 = int_to_ptr.hbm [resolvable:$true] %s735_s4 }
  0x34   :  { %560 = vmatpush.bf16.msrb.mxu1 %v1073_v52 }
  0x35   :  { %719 = vmatpush.bf16.msra.mxu2 %v1087_v48 }
  0x36   :  { %659 = vmatpush.bf16.msrb.mxu3 %v1082_v9 }
  0x37   :  { %547 = vmatpush.bf16.msrb.mxu0 %v1064_v53 }
  0x38   :  { %561 = vmatpush.bf16.msrb.mxu1 %v1072_v54  ;;  %972 = vmatmul.msk.bf16.vlgmr.msrb.gmra.mxu2 %vm483_vm0, %v775_v59 }
  0x39   :  { %720 = vmatpush.bf16.msra.mxu2 %v1086_v49 }
  0x3a   :  { %660 = vmatpush.bf16.msrb.mxu3 %v1081_v10 }
  0x3b   :  { %548 = vmatpush.bf16.msrb.mxu0 %v1063_v57 }
  0x3c   :  { %562 = vmatpush.bf16.msrb.mxu1 %v1071_v58  ;;  %v1098_v58 = vld [vmem:[%s1296_s6] ss:$0 sm:$0xff] }
  0x3e   :  { %661 = vmatpush.bf16.msrb.mxu3 %v1080_v11 }
  0x3f   :  { %549 = vmatpush.bf16.msrb.mxu0 %v1062_v60 }
  0x40   :  { %563 = vmatpush.bf16.msrb.mxu1 %v1070_v61 }
  0x42   :  { %662 = vmatpush.bf16.msrb.mxu3 %v1079_v12 }
  0x43   :  { %550 = vmatpush.bf16.msrb.mxu0 %v1061_v62 }
  0x44   :  { %564 = vmatpush.bf16.msrb.mxu1 %v1069_v63 }
  0x46   :  { %551 = vmatmul.bf16.vlgmr.msrb.gmra.mxu0 %v767_v4  ;;  %663 = vmatpush.bf16.msrb.mxu3 %v1078_v16 }
  0x47   :  { %565 = vmatmul.bf16.vlgmr.msrb.gmra.mxu1 %v771_v5 }
  0xa3   :  { %v496_v13 = vpop.f32.mrf.mxu0 }
  0xa4   :  { %v510_v14 = vpop.f32.mrf.mxu1  ;;  %v497_v19 = vadd.f32 %v1096_v17, %v496_v13 }
  0xa6   :  { %v511_v23 = vadd.f32 %v510_v14, %v497_v19 }
  0xab   :  { %v524_v15 = vpop.f32.mrf.mxu2  ;;  %v498_v20 = vpop.f32.mrf.mxu0 }
  0xac   :  { %v512_v21 = vpop.f32.mrf.mxu1  ;;  %v538_v24 = vpop.f32.mrf.mxu3  ;;  %v499_v25 = vadd.f32 %v1096_v17, %v498_v20  ;;  %v525_v26 = vadd.f32 %v524_v15, %v511_v23 }
  0xae   :  { %v513_v27 = vadd.f32 %v512_v21, %v499_v25  ;;  %v539_v30 = vadd.f32 %v538_v24, %v525_v26 }
  0xb3   :  { %v526_v22 = vpop.f32.mrf.mxu2 }
  0xb4   :  { %v527_v32 = vadd.f32 %v526_v22, %v513_v27  ;;  %v540_v34 = vpop.f32.mrf.mxu3 }
  0xb6   :  { %v541_v35 = vadd.f32 %v540_v34, %v527_v32 }
  0xbb   :  { %v580_v31 = vpop.f32.mrf.mxu2 }
  0xc3   :  { %v552_v28 = vpop.f32.mrf.mxu0  ;;  %v582_v42 = vpop.f32.mrf.mxu2 }
  0xc4   :  { %v566_v29 = vpop.f32.mrf.mxu1  ;;  %v553_v33 = vadd.f32 %v552_v28, %v539_v30 }
  0xc6   :  { %v567_v36 = vadd.f32 %v566_v29, %v553_v33 }
  0xc8   :  { %v581_v40 = vadd.f32 %v580_v31, %v567_v36 }
  0xca   :  { %v585_v44 = vmax.f32 %v581_v40, 0.0 }
  0xcb   :  { %v554_v37 = vpop.f32.mrf.mxu0 }
  0xcc   :  { %v555_v38 = vadd.f32 %v554_v37, %v541_v35  ;;  %v568_v39 = vpop.f32.mrf.mxu1 }
  0xce   :  { %v569_v41 = vadd.f32 %v568_v39, %v555_v38 }
  0xd0   :  { %v583_v43 = vadd.f32 %v582_v42, %v569_v41 }
  0xd2   :  { %v586_v45 = vmax.f32 %v583_v43, 0.0 }
  0xd4   :  { %v587_v46 = vpack.c.bf16 %v586_v45, %v585_v44 }
  0xd6   :  { %664 = vmatmul.bf16.vlgmr.msrb.gmra.mxu3 %v587_v46 }
 0x159   :  { %v665_v50 = vpop.f32.mrf.mxu3 }
 0x15a   :  { %v666_v52 = vadd.f32 %v1097_v51, %v665_v50 }
 0x15c   :  { %v670_v55 = vmax.f32 %v666_v52, 0.0 }
 0x161   :  { %v667_v53 = vpop.f32.mrf.mxu3 }
 0x162   :  { %v668_v54 = vadd.f32 %v1097_v51, %v667_v53 }
 0x164   :  { %v671_v56 = vmax.f32 %v668_v54, 0.0 }
 0x166   :  { %v672_v57 = vpack.c.bf16 %v671_v56, %v670_v55 }
 0x168   :  { %1021 = vmatmul.msk.bf16.vlgmr.msra.gmra.mxu2 %vm709_vm1, %v672_v57 }
 0x1eb   :  { %v722_v59 = vpop.f32.mrf.mxu2 }
 0x1ec   :  { %v723_v60 = vadd.f32 %v1098_v58, %v722_v59 }
 0x1ee   :  { %727 = vst [vmem:[#allocation5] sm:$0xff] %v723_v60 }
 0x1f3   :  { %v724_v61 = vpop.f32.mrf.mxu2 }
 0x1f4   :  { %v725_v62 = vadd.f32 %v1098_v58, %v724_v61 }
 0x1f6   :  { %728 = vst [vmem:[#allocation5 + $0x8] sm:$0xff] %v725_v62 }
 0x1f7   :  { %741 = dma.vmem_to_hbm [thread:$0]  %s734_s14, 256, %s736_s4, [#allocation4], %s1155_s0, %s1155_s0, %s1156_s17  }
 0x1f8   :  { %1149 = dma.done.wait [#allocation4], 256  }
 0x1f9   :  { %1150 = vsyncadd [#allocation4], 4294967040 }
 0x1fa   :  { %746 = vsyncpa [#allocation3], 1 }
 0x1fb   :  { %747 = vsyncpa [#allocation4], 1 }

</bundles_post_ra>
